<compile_context>
chip_gen: v6e
topology: v6e:2x2x1
jax: 0.10.0
libtpu: 0.0.40
codegen_flags: <defaults>
</compile_context>

<pallas_src>
import jax
import jax.numpy as jnp
import numpy as np
from jax.experimental import pallas as pl
from jax.experimental.pallas import tpu as pltpu


PAD_LANES = 128          # lane width
MAX_TB = 512             # batch-tile rows (amortizes per-grid-step overhead)


def _round_up(x, m):
    return ((x + m - 1) // m) * m


# ----------------------------------------------------------------------------
# Pallas kernel factory: fused n-layer MLP (encoder-only n=5, full n=10)
# ----------------------------------------------------------------------------
def _make_mlp_kernel(n_layers):
    # ReLU (+ dropout=identity in inference) after every layer except
    # enc_fc5 (global layer idx 4) and dec_fc5 (global layer idx 9).
    no_act = (4, 9)

    def kernel(x_ref, w_ref, b_ref, out_ref):
        h = x_ref[...]                                # (TB, PAD) bf16
        acc = None
        for l in range(n_layers):                     # static unrolled loop
            acc = jnp.dot(h, w_ref[l],
                          preferred_element_type=jnp.float32) + b_ref[l]
            if l not in no_act:
                acc = jnp.maximum(acc, jnp.float32(0.0))
            h = acc.astype(jnp.bfloat16)              # bf16 feed to next MXU op
        out_ref[...] = acc.astype(out_ref.dtype)      # f32, lane-dense store

    return kernel


def _run_mlp_pallas(x_flat, w_stack, b_stack, n_layers, out_features, pad):
    """Run the fused MLP over a batch grid; returns (B, out_features) f32."""
    B, f_in = x_flat.shape
    TB = min(MAX_TB, _round_up(B, 8))
    B_pad = _round_up(B, TB)

    # zero-pad batch and feature dims, cast activations to bf16
    x_pad = jnp.zeros((B_pad, pad), jnp.bfloat16)
    x_pad = x_pad.at[:B, :f_in].set(x_flat.astype(jnp.bfloat16))

    w = w_stack[:n_layers]                            # (n_layers, pad, pad) bf16
    b = b_stack[:n_layers]                            # (n_layers, 1, pad)  f32

    kernel = _make_mlp_kernel(n_layers)
    out = pl.pallas_call(
        kernel,
        out_shape=jax.ShapeDtypeStruct((B_pad, pad), jnp.float32),
        grid_spec=pltpu.PrefetchScalarGridSpec(
            num_scalar_prefetch=0,
            grid=(B_pad // TB,),
            in_specs=[
                # batch-tiled activations
                pl.BlockSpec((TB, pad), lambda i: (i, 0)),
                # weights / biases: constant index_map -> VMEM-resident
                pl.BlockSpec((n_layers, pad, pad), lambda i: (0, 0, 0)),
                pl.BlockSpec((n_layers, 1, pad), lambda i: (0, 0, 0)),
            ],
            out_specs=pl.BlockSpec((TB, pad), lambda i: (i, 0)),
        ),
        compiler_params=pltpu.CompilerParams(
            dimension_semantics=("parallel",),
            vmem_limit_bytes=32 * 1024 * 1024,
        ),
    )(x_pad, w, b)
    return out[:B, :out_features]


# ----------------------------------------------------------------------------
# Parameter construction + packing
# ----------------------------------------------------------------------------
def init_params(key, f_in, hidden_units, f_embedding):
    dims = [
        (f_in, hidden_units),          # enc_fc1
        (hidden_units, hidden_units),  # enc_fc2
        (hidden_units, hidden_units),  # enc_fc3
        (hidden_units, hidden_units),  # enc_fc4
        (hidden_units, f_embedding),   # enc_fc5
        (f_embedding, hidden_units),   # dec_fc1
        (hidden_units, hidden_units),  # dec_fc2
        (hidden_units, hidden_units),  # dec_fc3
        (hidden_units, hidden_units),  # dec_fc4
        (hidden_units, f_in),          # dec_fc5
    ]
    params = []
    for i, (din, dout) in enumerate(dims):
        kw, kb = jax.random.split(jax.random.fold_in(key, i))
        scale = 1.0 / np.sqrt(din)
        # Stored pre-transposed as (in, out); PyTorch nn.Linear stores (out, in).
        w = jax.random.uniform(kw, (din, dout), jnp.float32, -scale, scale)
        b = jax.random.uniform(kb, (1, dout), jnp.float32, -scale, scale)
        params.append((w, b))
    return params


def pack_params(params, f_in, hidden_units, f_embedding):
    """Zero-pad every layer to (PAD, PAD), stack, cast weights to bf16."""
    pad = _round_up(max(f_in, hidden_units, f_embedding, 1), PAD_LANES)
    w_list, b_list = [], []
    for (w, b) in params:
        din, dout = w.shape
        w_pad = jnp.zeros((pad, pad), jnp.float32).at[:din, :dout].set(w)
        b_pad = jnp.zeros((1, pad), jnp.float32).at[:, :dout].set(b)
        w_list.append(w_pad)
        b_list.append(b_pad)
    w_stack = jnp.stack(w_list).astype(jnp.bfloat16)   # (10, pad, pad) bf16
    b_stack = jnp.stack(b_list)                        # (10, 1, pad)   f32
    return {
        "w_stack": w_stack,
        "b_stack": b_stack,
        "f_in": f_in,
        "hidden_units": hidden_units,
        "f_embedding": f_embedding,
        "pad": pad,
    }


# ----------------------------------------------------------------------------
# Forward wrapper (mirrors MultimodalAutoencoder.forward)
# ----------------------------------------------------------------------------
def multimodal_autoencoder_forward(skel, packed, return_embeddings=False,
                                   compute_reconstruction=True):
    # self.skel.set_decode_mode(False); skel = self.skel(skel)
    # TODO(synk): external skel sub-module -> identity
    skel_enc = skel
    skel_size = skel_enc.shape
    B = skel_size[0]
    x_flat = skel_enc.reshape(B, -1).astype(jnp.float32)
    f_in = x_flat.shape[1]
    assert f_in == packed["f_in"]

    if return_embeddings:
        # encoder-only kernel: half the FLOPs, no rec writeback
        return _run_mlp_pallas(x_flat, packed["w_stack"], packed["b_stack"],
                               n_layers=5,
                               out_features=packed["f_embedding"],
                               pad=packed["pad"])

    # skel = skel.view(*skel_size); set_decode_mode(True); skel = self.skel(skel)
    skel_dec = skel_enc  # identity decode (placeholder skel module)

    if not compute_reconstruction:
        # PyTorch discards the MLP reconstruction in this path; skip its cost.
        return skel_dec

    rec = _run_mlp_pallas(x_flat, packed["w_stack"], packed["b_stack"],
                          n_layers=10, out_features=f_in, pad=packed["pad"])
    # rec is returned as an auxiliary output purely for verification.
    return skel_dec, rec


# ----------------------------------------------------------------------------
# Pure-JAX reference matching the kernel's bf16/f32 numerics
# ----------------------------------------------------------------------------
def _mlp_reference(x_flat, params):
    h = x_flat.astype(jnp.bfloat16)
    z = None
    acc = None
    for i, (w, b) in enumerate(params):
        acc = jnp.dot(h, w.astype(jnp.bfloat16),
                      preferred_element_type=jnp.float32) + b
        if i not in (4, 9):
            acc = jnp.maximum(acc, 0.0)
        if i == 4:
            z = acc
        h = acc.astype(jnp.bfloat16)
    return z, acc


if __name__ == "__main__":
    key = jax.random.PRNGKey(0)
    k_params, k_input = jax.random.split(key)

    # small shapes consistent with the module
    B, J, C = 8, 32, 3          # skeleton: batch, joints, coords
    f_in = J * C                # 96
    hidden_units = 64
    f_embedding = 32
    dropout = 0.1               # inference mode -> identity

    params = init_params(k_params, f_in, hidden_units, f_embedding)
    packed = pack_params(params, f_in, hidden_units, f_embedding)
    skel = jax.random.normal(k_input, (B, J, C), jnp.float32)

    out, rec = multimodal_autoencoder_forward(skel, packed,
                                              return_embeddings=False,
                                              compute_reconstruction=True)
    emb = multimodal_autoencoder_forward(skel, packed, return_embeddings=True)
    out_fast = multimodal_autoencoder_forward(skel, packed,
                                              return_embeddings=False,
                                              compute_reconstruction=False)
    jax.block_until_ready((out, rec, emb, out_fast))

    # verify the Pallas MLP against a plain-JAX reference with matched numerics
    x_flat = skel.reshape(B, -1)
    emb_ref, rec_ref = _mlp_reference(x_flat, params)

    assert out.shape == skel.shape and jnp.array_equal(out, skel), \
        "skel identity path mismatch"
    assert jnp.array_equal(out_fast, skel), "fast path mismatch"
    assert emb.shape == (B, f_embedding)
    assert rec.shape == (B, f_in)
    assert jnp.allclose(emb, emb_ref, atol=1e-2, rtol=1e-2), "embedding mismatch"
    assert jnp.allclose(rec, rec_ref, atol=1e-2, rtol=1e-2), "reconstruction mismatch"

    print("KERNEL_OK")
</pallas_src>

<mosaic_0001>
module attributes {stable_mosaic.version = 11 : i64} {
  func.func @kernel(%arg0: i32, %arg1: memref<8x128xbf16, #tpu.memory_space<vmem>>, %arg2: memref<10x128x128xbf16, #tpu.memory_space<vmem>>, %arg3: memref<10x1x128xf32, #tpu.memory_space<vmem>>, %arg4: memref<8x128xf32, #tpu.memory_space<vmem>>) attributes {dimension_semantics = [#tpu.dimension_semantics<parallel>], iteration_bounds = array<i64: 1>, scalar_prefetch = 0 : i64, scratch_operands = 0 : i64, tpu.core_type = #tpu.core_type<tc>, window_params = [{transform_indices = @transform_0, window_bounds = array<i64: 8, 128>}, {pipeline_mode = #tpu.pipeline_mode<synchronous>, transform_indices = @transform_1, window_bounds = array<i64: 10, 128, 128>}, {pipeline_mode = #tpu.pipeline_mode<synchronous>, transform_indices = @transform_2, window_bounds = array<i64: 10, 1, 128>}, {transform_indices = @transform_3, window_bounds = array<i64: 8, 128>}]} {
    %c0 = arith.constant 0 : index
    %c0_0 = arith.constant 0 : index
    %0 = vector.load %arg1[%c0, %c0_0] : memref<8x128xbf16, #tpu.memory_space<vmem>>, vector<8x128xbf16>
    %c0_1 = arith.constant 0 : index
    %c0_2 = arith.constant 0 : index
    %c0_3 = arith.constant 0 : index
    %1 = vector.load %arg2[%c0_1, %c0_2, %c0_3] : memref<10x128x128xbf16, #tpu.memory_space<vmem>>, vector<1x128x128xbf16>
    %2 = vector.shape_cast %1 : vector<1x128x128xbf16> to vector<128x128xbf16>
    %cst = arith.constant dense<0.000000e+00> : vector<8x128xf32>
    %3 = tpu.matmul %0, %2, %cst {dimension_numbers = #tpu.dot_dimension_numbers<[1], [0], [0], [1], [0, 0, 1, 1], [], []>} : vector<8x128xbf16>, vector<128x128xbf16>, vector<8x128xf32> -> vector<8x128xf32>
    %c0_4 = arith.constant 0 : index
    %c0_5 = arith.constant 0 : index
    %c0_6 = arith.constant 0 : index
    %4 = vector.load %arg3[%c0_4, %c0_5, %c0_6] : memref<10x1x128xf32, #tpu.memory_space<vmem>>, vector<1x1x128xf32>
    %5 = vector.shape_cast %4 : vector<1x1x128xf32> to vector<1x128xf32>
    %6 = vector.broadcast %5 : vector<1x128xf32> to vector<8x128xf32>
    %7 = arith.addf %3, %6 : vector<8x128xf32>
    %cst_7 = arith.constant 0.000000e+00 : f32
    %8 = vector.broadcast %cst_7 : f32 to vector<8x128xf32>
    %9 = arith.maximumf %7, %8 : vector<8x128xf32>
    %10 = arith.truncf %9 : vector<8x128xf32> to vector<8x128xbf16>
    %c1 = arith.constant 1 : index
    %c0_8 = arith.constant 0 : index
    %c0_9 = arith.constant 0 : index
    %11 = vector.load %arg2[%c1, %c0_8, %c0_9] : memref<10x128x128xbf16, #tpu.memory_space<vmem>>, vector<1x128x128xbf16>
    %12 = vector.shape_cast %11 : vector<1x128x128xbf16> to vector<128x128xbf16>
    %cst_10 = arith.constant dense<0.000000e+00> : vector<8x128xf32>
    %13 = tpu.matmul %10, %12, %cst_10 {dimension_numbers = #tpu.dot_dimension_numbers<[1], [0], [0], [1], [0, 0, 1, 1], [], []>} : vector<8x128xbf16>, vector<128x128xbf16>, vector<8x128xf32> -> vector<8x128xf32>
    %c1_11 = arith.constant 1 : index
    %c0_12 = arith.constant 0 : index
    %c0_13 = arith.constant 0 : index
    %14 = vector.load %arg3[%c1_11, %c0_12, %c0_13] : memref<10x1x128xf32, #tpu.memory_space<vmem>>, vector<1x1x128xf32>
    %15 = vector.shape_cast %14 : vector<1x1x128xf32> to vector<1x128xf32>
    %16 = vector.broadcast %15 : vector<1x128xf32> to vector<8x128xf32>
    %17 = arith.addf %13, %16 : vector<8x128xf32>
    %cst_14 = arith.constant 0.000000e+00 : f32
    %18 = vector.broadcast %cst_14 : f32 to vector<8x128xf32>
    %19 = arith.maximumf %17, %18 : vector<8x128xf32>
    %20 = arith.truncf %19 : vector<8x128xf32> to vector<8x128xbf16>
    %c2 = arith.constant 2 : index
    %c0_15 = arith.constant 0 : index
    %c0_16 = arith.constant 0 : index
    %21 = vector.load %arg2[%c2, %c0_15, %c0_16] : memref<10x128x128xbf16, #tpu.memory_space<vmem>>, vector<1x128x128xbf16>
    %22 = vector.shape_cast %21 : vector<1x128x128xbf16> to vector<128x128xbf16>
    %cst_17 = arith.constant dense<0.000000e+00> : vector<8x128xf32>
    %23 = tpu.matmul %20, %22, %cst_17 {dimension_numbers = #tpu.dot_dimension_numbers<[1], [0], [0], [1], [0, 0, 1, 1], [], []>} : vector<8x128xbf16>, vector<128x128xbf16>, vector<8x128xf32> -> vector<8x128xf32>
    %c2_18 = arith.constant 2 : index
    %c0_19 = arith.constant 0 : index
    %c0_20 = arith.constant 0 : index
    %24 = vector.load %arg3[%c2_18, %c0_19, %c0_20] : memref<10x1x128xf32, #tpu.memory_space<vmem>>, vector<1x1x128xf32>
    %25 = vector.shape_cast %24 : vector<1x1x128xf32> to vector<1x128xf32>
    %26 = vector.broadcast %25 : vector<1x128xf32> to vector<8x128xf32>
    %27 = arith.addf %23, %26 : vector<8x128xf32>
    %cst_21 = arith.constant 0.000000e+00 : f32
    %28 = vector.broadcast %cst_21 : f32 to vector<8x128xf32>
    %29 = arith.maximumf %27, %28 : vector<8x128xf32>
    %30 = arith.truncf %29 : vector<8x128xf32> to vector<8x128xbf16>
    %c3 = arith.constant 3 : index
    %c0_22 = arith.constant 0 : index
    %c0_23 = arith.constant 0 : index
    %31 = vector.load %arg2[%c3, %c0_22, %c0_23] : memref<10x128x128xbf16, #tpu.memory_space<vmem>>, vector<1x128x128xbf16>
    %32 = vector.shape_cast %31 : vector<1x128x128xbf16> to vector<128x128xbf16>
    %cst_24 = arith.constant dense<0.000000e+00> : vector<8x128xf32>
    %33 = tpu.matmul %30, %32, %cst_24 {dimension_numbers = #tpu.dot_dimension_numbers<[1], [0], [0], [1], [0, 0, 1, 1], [], []>} : vector<8x128xbf16>, vector<128x128xbf16>, vector<8x128xf32> -> vector<8x128xf32>
    %c3_25 = arith.constant 3 : index
    %c0_26 = arith.constant 0 : index
    %c0_27 = arith.constant 0 : index
    %34 = vector.load %arg3[%c3_25, %c0_26, %c0_27] : memref<10x1x128xf32, #tpu.memory_space<vmem>>, vector<1x1x128xf32>
    %35 = vector.shape_cast %34 : vector<1x1x128xf32> to vector<1x128xf32>
    %36 = vector.broadcast %35 : vector<1x128xf32> to vector<8x128xf32>
    %37 = arith.addf %33, %36 : vector<8x128xf32>
    %cst_28 = arith.constant 0.000000e+00 : f32
    %38 = vector.broadcast %cst_28 : f32 to vector<8x128xf32>
    %39 = arith.maximumf %37, %38 : vector<8x128xf32>
    %40 = arith.truncf %39 : vector<8x128xf32> to vector<8x128xbf16>
    %c4 = arith.constant 4 : index
    %c0_29 = arith.constant 0 : index
    %c0_30 = arith.constant 0 : index
    %41 = vector.load %arg2[%c4, %c0_29, %c0_30] : memref<10x128x128xbf16, #tpu.memory_space<vmem>>, vector<1x128x128xbf16>
    %42 = vector.shape_cast %41 : vector<1x128x128xbf16> to vector<128x128xbf16>
    %cst_31 = arith.constant dense<0.000000e+00> : vector<8x128xf32>
    %43 = tpu.matmul %40, %42, %cst_31 {dimension_numbers = #tpu.dot_dimension_numbers<[1], [0], [0], [1], [0, 0, 1, 1], [], []>} : vector<8x128xbf16>, vector<128x128xbf16>, vector<8x128xf32> -> vector<8x128xf32>
    %c4_32 = arith.constant 4 : index
    %c0_33 = arith.constant 0 : index
    %c0_34 = arith.constant 0 : index
    %44 = vector.load %arg3[%c4_32, %c0_33, %c0_34] : memref<10x1x128xf32, #tpu.memory_space<vmem>>, vector<1x1x128xf32>
    %45 = vector.shape_cast %44 : vector<1x1x128xf32> to vector<1x128xf32>
    %46 = vector.broadcast %45 : vector<1x128xf32> to vector<8x128xf32>
    %47 = arith.addf %43, %46 : vector<8x128xf32>
    %48 = arith.truncf %47 : vector<8x128xf32> to vector<8x128xbf16>
    %c5 = arith.constant 5 : index
    %c0_35 = arith.constant 0 : index
    %c0_36 = arith.constant 0 : index
    %49 = vector.load %arg2[%c5, %c0_35, %c0_36] : memref<10x128x128xbf16, #tpu.memory_space<vmem>>, vector<1x128x128xbf16>
    %50 = vector.shape_cast %49 : vector<1x128x128xbf16> to vector<128x128xbf16>
    %cst_37 = arith.constant dense<0.000000e+00> : vector<8x128xf32>
    %51 = tpu.matmul %48, %50, %cst_37 {dimension_numbers = #tpu.dot_dimension_numbers<[1], [0], [0], [1], [0, 0, 1, 1], [], []>} : vector<8x128xbf16>, vector<128x128xbf16>, vector<8x128xf32> -> vector<8x128xf32>
    %c5_38 = arith.constant 5 : index
    %c0_39 = arith.constant 0 : index
    %c0_40 = arith.constant 0 : index
    %52 = vector.load %arg3[%c5_38, %c0_39, %c0_40] : memref<10x1x128xf32, #tpu.memory_space<vmem>>, vector<1x1x128xf32>
    %53 = vector.shape_cast %52 : vector<1x1x128xf32> to vector<1x128xf32>
    %54 = vector.broadcast %53 : vector<1x128xf32> to vector<8x128xf32>
    %55 = arith.addf %51, %54 : vector<8x128xf32>
    %cst_41 = arith.constant 0.000000e+00 : f32
    %56 = vector.broadcast %cst_41 : f32 to vector<8x128xf32>
    %57 = arith.maximumf %55, %56 : vector<8x128xf32>
    %58 = arith.truncf %57 : vector<8x128xf32> to vector<8x128xbf16>
    %c6 = arith.constant 6 : index
    %c0_42 = arith.constant 0 : index
    %c0_43 = arith.constant 0 : index
    %59 = vector.load %arg2[%c6, %c0_42, %c0_43] : memref<10x128x128xbf16, #tpu.memory_space<vmem>>, vector<1x128x128xbf16>
    %60 = vector.shape_cast %59 : vector<1x128x128xbf16> to vector<128x128xbf16>
    %cst_44 = arith.constant dense<0.000000e+00> : vector<8x128xf32>
    %61 = tpu.matmul %58, %60, %cst_44 {dimension_numbers = #tpu.dot_dimension_numbers<[1], [0], [0], [1], [0, 0, 1, 1], [], []>} : vector<8x128xbf16>, vector<128x128xbf16>, vector<8x128xf32> -> vector<8x128xf32>
    %c6_45 = arith.constant 6 : index
    %c0_46 = arith.constant 0 : index
    %c0_47 = arith.constant 0 : index
    %62 = vector.load %arg3[%c6_45, %c0_46, %c0_47] : memref<10x1x128xf32, #tpu.memory_space<vmem>>, vector<1x1x128xf32>
    %63 = vector.shape_cast %62 : vector<1x1x128xf32> to vector<1x128xf32>
    %64 = vector.broadcast %63 : vector<1x128xf32> to vector<8x128xf32>
    %65 = arith.addf %61, %64 : vector<8x128xf32>
    %cst_48 = arith.constant 0.000000e+00 : f32
    %66 = vector.broadcast %cst_48 : f32 to vector<8x128xf32>
    %67 = arith.maximumf %65, %66 : vector<8x128xf32>
    %68 = arith.truncf %67 : vector<8x128xf32> to vector<8x128xbf16>
    %c7 = arith.constant 7 : index
    %c0_49 = arith.constant 0 : index
    %c0_50 = arith.constant 0 : index
    %69 = vector.load %arg2[%c7, %c0_49, %c0_50] : memref<10x128x128xbf16, #tpu.memory_space<vmem>>, vector<1x128x128xbf16>
    %70 = vector.shape_cast %69 : vector<1x128x128xbf16> to vector<128x128xbf16>
    %cst_51 = arith.constant dense<0.000000e+00> : vector<8x128xf32>
    %71 = tpu.matmul %68, %70, %cst_51 {dimension_numbers = #tpu.dot_dimension_numbers<[1], [0], [0], [1], [0, 0, 1, 1], [], []>} : vector<8x128xbf16>, vector<128x128xbf16>, vector<8x128xf32> -> vector<8x128xf32>
    %c7_52 = arith.constant 7 : index
    %c0_53 = arith.constant 0 : index
    %c0_54 = arith.constant 0 : index
    %72 = vector.load %arg3[%c7_52, %c0_53, %c0_54] : memref<10x1x128xf32, #tpu.memory_space<vmem>>, vector<1x1x128xf32>
    %73 = vector.shape_cast %72 : vector<1x1x128xf32> to vector<1x128xf32>
    %74 = vector.broadcast %73 : vector<1x128xf32> to vector<8x128xf32>
    %75 = arith.addf %71, %74 : vector<8x128xf32>
    %cst_55 = arith.constant 0.000000e+00 : f32
    %76 = vector.broadcast %cst_55 : f32 to vector<8x128xf32>
    %77 = arith.maximumf %75, %76 : vector<8x128xf32>
    %78 = arith.truncf %77 : vector<8x128xf32> to vector<8x128xbf16>
    %c8 = arith.constant 8 : index
    %c0_56 = arith.constant 0 : index
    %c0_57 = arith.constant 0 : index
    %79 = vector.load %arg2[%c8, %c0_56, %c0_57] : memref<10x128x128xbf16, #tpu.memory_space<vmem>>, vector<1x128x128xbf16>
    %80 = vector.shape_cast %79 : vector<1x128x128xbf16> to vector<128x128xbf16>
    %cst_58 = arith.constant dense<0.000000e+00> : vector<8x128xf32>
    %81 = tpu.matmul %78, %80, %cst_58 {dimension_numbers = #tpu.dot_dimension_numbers<[1], [0], [0], [1], [0, 0, 1, 1], [], []>} : vector<8x128xbf16>, vector<128x128xbf16>, vector<8x128xf32> -> vector<8x128xf32>
    %c8_59 = arith.constant 8 : index
    %c0_60 = arith.constant 0 : index
    %c0_61 = arith.constant 0 : index
    %82 = vector.load %arg3[%c8_59, %c0_60, %c0_61] : memref<10x1x128xf32, #tpu.memory_space<vmem>>, vector<1x1x128xf32>
    %83 = vector.shape_cast %82 : vector<1x1x128xf32> to vector<1x128xf32>
    %84 = vector.broadcast %83 : vector<1x128xf32> to vector<8x128xf32>
    %85 = arith.addf %81, %84 : vector<8x128xf32>
    %cst_62 = arith.constant 0.000000e+00 : f32
    %86 = vector.broadcast %cst_62 : f32 to vector<8x128xf32>
    %87 = arith.maximumf %85, %86 : vector<8x128xf32>
    %88 = arith.truncf %87 : vector<8x128xf32> to vector<8x128xbf16>
    %c9 = arith.constant 9 : index
    %c0_63 = arith.constant 0 : index
    %c0_64 = arith.constant 0 : index
    %89 = vector.load %arg2[%c9, %c0_63, %c0_64] : memref<10x128x128xbf16, #tpu.memory_space<vmem>>, vector<1x128x128xbf16>
    %90 = vector.shape_cast %89 : vector<1x128x128xbf16> to vector<128x128xbf16>
    %cst_65 = arith.constant dense<0.000000e+00> : vector<8x128xf32>
    %91 = tpu.matmul %88, %90, %cst_65 {dimension_numbers = #tpu.dot_dimension_numbers<[1], [0], [0], [1], [0, 0, 1, 1], [], []>} : vector<8x128xbf16>, vector<128x128xbf16>, vector<8x128xf32> -> vector<8x128xf32>
    %c9_66 = arith.constant 9 : index
    %c0_67 = arith.constant 0 : index
    %c0_68 = arith.constant 0 : index
    %92 = vector.load %arg3[%c9_66, %c0_67, %c0_68] : memref<10x1x128xf32, #tpu.memory_space<vmem>>, vector<1x1x128xf32>
    %93 = vector.shape_cast %92 : vector<1x1x128xf32> to vector<1x128xf32>
    %94 = vector.broadcast %93 : vector<1x128xf32> to vector<8x128xf32>
    %95 = arith.addf %91, %94 : vector<8x128xf32>
    %c0_69 = arith.constant 0 : index
    %c0_70 = arith.constant 0 : index
    %96 = vector.load %arg4[%c0_69, %c0_70] : memref<8x128xf32, #tpu.memory_space<vmem>>, vector<8x128xf32>
    tpu.vector_store %arg4[%c0_69, %c0_70], %95 {strides = array<i32>} : memref<8x128xf32, #tpu.memory_space<vmem>>, vector<8x128xf32>,
    return
  }
  func.func @transform_0(%arg0: i32) -> (i32, i32) {
    %c0_i32 = arith.constant 0 : i32
    %c0_i32_0 = arith.constant 0 : i32
    return %arg0, %c0_i32 : i32, i32
  }
  func.func @transform_1(%arg0: i32) -> (i32, i32, i32) {
    %c0_i32 = arith.constant 0 : i32
    %c0_i32_0 = arith.constant 0 : i32
    %c0_i32_1 = arith.constant 0 : i32
    %c0_i32_2 = arith.constant 0 : i32
    return %c0_i32, %c0_i32_0, %c0_i32_1 : i32, i32, i32
  }
  func.func @transform_2(%arg0: i32) -> (i32, i32, i32) {
    %c0_i32 = arith.constant 0 : i32
    %c0_i32_0 = arith.constant 0 : i32
    %c0_i32_1 = arith.constant 0 : i32
    %c0_i32_2 = arith.constant 0 : i32
    return %c0_i32, %c0_i32_0, %c0_i32_1 : i32, i32, i32
  }
  func.func @transform_3(%arg0: i32) -> (i32, i32) {
    %c0_i32 = arith.constant 0 : i32
    %c0_i32_0 = arith.constant 0 : i32
    return %arg0, %c0_i32 : i32, i32
  }
}

</mosaic_0001>

<bundles_post_ra>
// kernel: tpu_custom_call.1
= control target key start
LH: loop header
LB: loop body
LE: loop exit
PB: predicated region body
PF: predicated region fallthrough
CT: control target
= control target key end

     0   :  { %8 = vsyncpa [#allocation3], 0  ;;  %s1916_s0 = inlined_call_operand.hbm [shape: bf16[8,128], index: 0, kind: input, shape index: {}]   ;;  %s1917_s1 = inlined_call_operand.hbm [shape: bf16[10,128,128], index: 1, kind: input, shape index: {}]   ;;  %s1918_s2 = inlined_call_operand.hbm [shape: f32[10,1,128], index: 2, kind: input, shape index: {}]   ;;  %s1919_s3 = inlined_call_operand.hbm [shape: f32[8,128], index: 3, kind: output, shape index: {}]  }
   0x1   :  { %9 = vsyncpa [#allocation6], 0 }
   0x2   :  { %10 = vsyncpa [#allocation4], 0  ;;  %s1774_s12 = smov [#allocation5]  }
   0x3   :  { %s26_s13 = sshll.u32 %s1774_s12, 4  ;;  %s27_s13 = int_to_ptr.vmem [resolvable:$true] %s26_s13 }
   0x4   :  { %s1696_s14 = scalar_lea.vmem %s27_s13, 10240  ;;  %p1701_p1 = scmp.lt.s32.totalorder %s27_s13, %s27_s13 }
   0x5   :  { %p1697_p0 = scmp.ne.s32.totalorder %s27_s13, %s1696_s14  ;;  %p1702_p2 = scmp.lt.s32.totalorder %s1696_s14, %s1696_s14 }
   0x7   :  { %p1703_p3 = por %p1702_p2, %p1701_p1 }
   0x9   :  { %p1704_p4 = pnand %p1703_p3, %p1697_p0 }
   0xb   :  { %1707 = shalt.err (!%p1704_p4)
}
   0xc   :  { %s1775_s15 = smov 64   ;;  %s1776_s16 = smov 4  }
   0xd   :  { %32 = dma.hbm_to_vmem [thread:$0]  %s1917_s1, 10240, %s27_s13, [#allocation6], %s1775_s15, %s1775_s15, %s1776_s16  }
   0xe   :  { %s1777_s19 = smov [#allocation2]   ;;  %s1778_s21 = smov [#allocation7]  }
   0xf   :  { %s17_s20 = sshll.u32 %s1777_s19, 4  ;;  %s38_s22 = sshll.u32 %s1778_s21, 4  ;;  %s18_s20 = int_to_ptr.vmem [resolvable:$true] %s17_s20  ;;  %s39_s22 = int_to_ptr.vmem [resolvable:$true] %s38_s22 }
  0x10   :  { %s1716_s23 = scalar_lea.vmem %s18_s20, 64  ;;  %p1721_p6 = scmp.lt.s32.totalorder %s18_s20, %s18_s20 }
  0x11   :  { %p1717_p5 = scmp.ne.s32.totalorder %s18_s20, %s1716_s23  ;;  %p1722_p7 = scmp.lt.s32.totalorder %s1716_s23, %s1716_s23 }
  0x13   :  { %p1723_p8 = por %p1722_p7, %p1721_p6 }
  0x15   :  { %p1724_p9 = pnand %p1723_p8, %p1717_p5 }
  0x17   :  { %1727 = shalt.err (!%p1724_p9)
}
  0x18   :  { %20 = dma.hbm_to_vmem [thread:$0]  %s1916_s0, 64, %s18_s20, [#allocation3]  }
  0x19   :  { %s1736_s26 = scalar_lea.vmem %s39_s22, 160  ;;  %p1741_p11 = scmp.lt.s32.totalorder %s39_s22, %s39_s22 }
  0x1a   :  { %p1737_p10 = scmp.ne.s32.totalorder %s39_s22, %s1736_s26  ;;  %p1742_p12 = scmp.lt.s32.totalorder %s1736_s26, %s1736_s26 }
  0x1c   :  { %p1743_p13 = por %p1742_p12, %p1741_p11 }
  0x1e   :  { %p1744_p0 = pnand %p1743_p13, %p1737_p10 }
  0x20   :  { %1747 = shalt.err (!%p1744_p0)
}
  0x21   :  { %s1779_s1 = smov 16   ;;  %s1780_s27 = smov 1  }
  0x22   :  { %44 = dma.hbm_to_vmem [thread:$0]  %s1918_s2, 160, %s39_s22, [#allocation6], %s1779_s1, %s1779_s1, %s1780_s27  }
  0x23   :  { %1768 = dma.done.wait [#allocation3], 64  }
  0x24   :  { %1769 = vsyncadd [#allocation3], 4294967232 }
  0x25   :  { %1770 = dma.done.wait [#allocation6], 10400  }
  0x26   :  { %1771 = vsyncadd [#allocation6], 4294956896  ;;  %v1781_v0 = vmov 0.0   ;;  %vm1782_vm0 = vmmov 0   ;;  %v1608_v1 = vld [vmem:[#allocation5 + $0x38] sm:$0xff]   ;;  %v1609_v2 = vld [vmem:[#allocation5 + $0x30] sm:$0xff]  }
  0x27   :  { %1398 = vmatprep.subr.bf16.mxu0 %v1781_v0  ;;  %1414 = vmatprep.mubr.msk.bf16.mxu0 %vm1782_vm0, %v1781_v0  ;;  %v1610_v3 = vld [vmem:[#allocation5 + $0x28] sm:$0xff]   ;;  %v1616_v4 = vld [vmem:[#allocation5 + $0x78] sm:$0xff]   ;;  %v1611_v5 = vld [vmem:[#allocation5 + $0x20] sm:$0xff]   ;;  %s1783_s0 = smov [#allocation8]  }
  0x28   :  { %1418 = vmatprep.subr.bf16.mxu1 %v1781_v0  ;;  %1434 = vmatprep.mubr.msk.bf16.mxu1 %vm1782_vm0, %v1781_v0  ;;  %v1617_v6 = vld [vmem:[#allocation5 + $0x70] sm:$0xff]   ;;  %v1612_v7 = vld [vmem:[#allocation5 + $0x18] sm:$0xff]   ;;  %v1618_v8 = vld [vmem:[#allocation5 + $0x68] sm:$0xff]   ;;  %s1208_s2 = sshll.u32 %s1783_s0, 4  ;;  %s1209_s2 = int_to_ptr.vmem [resolvable:$true] %s1208_s2 }
  0x29   :  { %1399 = vmatpush3.bf16.msra.mxu0 %v1608_v1  ;;  %1419 = vmatpush3.bf16.msra.mxu1 %v1616_v4  ;;  %v1613_v9 = vld [vmem:[#allocation5 + $0x10] sm:$0xff]   ;;  %v1619_v10 = vld [vmem:[#allocation5 + $0x60] sm:$0xff]   ;;  %v1614_v11 = vld [vmem:[#allocation5 + $0x8] sm:$0xff]   ;;  %s1748_s30 = scalar_lea.vmem %s1209_s2, 128  ;;  %p1753_p2 = scmp.lt.s32.totalorder %s1209_s2, %s1209_s2 }
  0x2a   :  { %1400 = vmatprep.subr.bf16.mxu0 %v1781_v0  ;;  %1420 = vmatprep.subr.bf16.mxu1 %v1781_v0  ;;  %v1620_v12 = vld [vmem:[#allocation5 + $0x58] sm:$0xff]   ;;  %v1615_v13 = vld [vmem:[#allocation5] sm:$0xff]   ;;  %v1621_v14 = vld [vmem:[#allocation5 + $0x50] sm:$0xff]   ;;  %p1749_p1 = scmp.ne.s32.totalorder %s1209_s2, %s1748_s30  ;;  %p1754_p3 = scmp.lt.s32.totalorder %s1748_s30, %s1748_s30 }
  0x2b   :  { %v55_v15 = vld [vmem:[#allocation2] sm:$0xf]  ;;  %v1622_v16 = vld [vmem:[#allocation5 + $0x48] sm:$0xff]   ;;  %v1623_v17 = vld [vmem:[#allocation5 + $0x40] sm:$0xff]  }
  0x2c   :  { %v1624_v18 = vld [vmem:[#allocation5 + $0xb8] sm:$0xff]   ;;  %v1625_v19 = vld [vmem:[#allocation5 + $0xb0] sm:$0xff]   ;;  %v1626_v20 = vld [vmem:[#allocation5 + $0xa8] sm:$0xff]   ;;  %p1755_p4 = por %p1754_p3, %p1753_p2 }
  0x2d   :  { %1401 = vmatpush3.bf16.msra.mxu0 %v1609_v2  ;;  %1421 = vmatpush3.bf16.msra.mxu1 %v1617_v6  ;;  %v1627_v21 = vld [vmem:[#allocation5 + $0xa0] sm:$0xff]   ;;  %v1628_v22 = vld [vmem:[#allocation5 + $0x98] sm:$0xff]   ;;  %v1629_v23 = vld [vmem:[#allocation5 + $0x90] sm:$0xff]  }
  0x2e   :  { %1402 = vmatprep.subr.bf16.mxu0 %v1781_v0  ;;  %1422 = vmatprep.subr.bf16.mxu1 %v1781_v0  ;;  %v1218_v24 = vld [vmem:[#allocation7] ss:$0 sm:$0xff]  ;;  %v1630_v32 = vld [vmem:[#allocation5 + $0x88] sm:$0xff]   ;;  %v1632_v34 = vld [vmem:[#allocation5 + $0xf8] sm:$0xff]   ;;  %p1756_p5 = pnand %p1755_p4, %p1749_p1 }
  0x2f   :  { %v1631_v33 = vld [vmem:[#allocation5 + $0x80] sm:$0xff]   ;;  %v1633_v35 = vld [vmem:[#allocation5 + $0xf0] sm:$0xff]   ;;  %v1634_v36 = vld [vmem:[#allocation5 + $0xe8] sm:$0xff]  }
  0x30   :  { %v1635_v37 = vld [vmem:[#allocation5 + $0xe0] sm:$0xff]   ;;  %v1636_v38 = vld [vmem:[#allocation5 + $0xd8] sm:$0xff]   ;;  %v1637_v39 = vld [vmem:[#allocation5 + $0xd0] sm:$0xff]  }
  0x31   :  { %1403 = vmatpush3.bf16.msra.mxu0 %v1610_v3  ;;  %1423 = vmatpush3.bf16.msra.mxu1 %v1618_v8  ;;  %v1227_v40 = vld [vmem:[#allocation7 + $0x1] ss:$0 sm:$0xff]  ;;  %v1638_v48 = vld [vmem:[#allocation5 + $0xc8] sm:$0xff]   ;;  %v1640_v50 = vld [vmem:[#allocation5 + $0x138] sm:$0xff]  }
  0x32   :  { %1404 = vmatprep.subr.bf16.mxu0 %v1781_v0  ;;  %1424 = vmatprep.subr.bf16.mxu1 %v1781_v0  ;;  %v1639_v49 = vld [vmem:[#allocation5 + $0xc0] sm:$0xff]   ;;  %v1641_v51 = vld [vmem:[#allocation5 + $0x130] sm:$0xff]   ;;  %v1642_v52 = vld [vmem:[#allocation5 + $0x128] sm:$0xff]  }
  0x33   :  { %v1643_v53 = vld [vmem:[#allocation5 + $0x120] sm:$0xff]   ;;  %v1644_v54 = vld [vmem:[#allocation5 + $0x118] sm:$0xff]   ;;  %v1645_v55 = vld [vmem:[#allocation5 + $0x110] sm:$0xff]  }
  0x34   :  { %v1236_v56 = vld [vmem:[#allocation7 + $0x2] ss:$0 sm:$0xff]  ;;  %v1646_v1 = vld [vmem:[#allocation5 + $0x108] sm:$0xff]   ;;  %v1648_v3 = vld [vmem:[#allocation5 + $0x178] sm:$0xff]  }
  0x35   :  { %1405 = vmatpush3.bf16.msra.mxu0 %v1611_v5  ;;  %1425 = vmatpush3.bf16.msra.mxu1 %v1619_v10  ;;  %v1647_v2 = vld [vmem:[#allocation5 + $0x100] sm:$0xff]   ;;  %v1649_v4 = vld [vmem:[#allocation5 + $0x170] sm:$0xff]   ;;  %v1650_v5 = vld [vmem:[#allocation5 + $0x168] sm:$0xff]  }
  0x36   :  { %1406 = vmatprep.subr.bf16.mxu0 %v1781_v0  ;;  %1426 = vmatprep.subr.bf16.mxu1 %v1781_v0  ;;  %v1651_v6 = vld [vmem:[#allocation5 + $0x160] sm:$0xff]   ;;  %v1653_v8 = vld [vmem:[#allocation5 + $0x150] sm:$0xff]  }
  0x37   :  { %v1245_v10 = vld [vmem:[#allocation7 + $0x3] ss:$0 sm:$0xff] }
  0x39   :  { %1407 = vmatpush3.bf16.msra.mxu0 %v1612_v7  ;;  %1427 = vmatpush3.bf16.msra.mxu1 %v1620_v12  ;;  %v1652_v7 = vld [vmem:[#allocation5 + $0x158] sm:$0xff]  }
  0x3a   :  { %1408 = vmatprep.subr.bf16.mxu0 %v1781_v0  ;;  %1428 = vmatprep.subr.bf16.mxu1 %v1781_v0 }
  0x3d   :  { %1409 = vmatpush3.bf16.msra.mxu0 %v1613_v9  ;;  %1429 = vmatpush3.bf16.msra.mxu1 %v1621_v14  ;;  %v1654_v9 = vld [vmem:[#allocation5 + $0x148] sm:$0xff]  }
  0x3e   :  { %1410 = vmatprep.subr.bf16.mxu0 %v1781_v0  ;;  %1430 = vmatprep.subr.bf16.mxu1 %v1781_v0 }
  0x41   :  { %1411 = vmatpush3.bf16.msra.mxu0 %v1614_v11  ;;  %1431 = vmatpush3.bf16.msra.mxu1 %v1622_v16 }
  0x42   :  { %1412 = vmatprep.subr.bf16.mxu0 %v1781_v0  ;;  %1432 = vmatprep.subr.bf16.mxu1 %v1781_v0 }
  0x45   :  { %1413 = vmatpush3.bf16.msra.mxu0 %v1615_v13  ;;  %1433 = vmatpush3.bf16.msra.mxu1 %v1623_v17 }
  0x46   :  { %1438 = vmatprep.subr.bf16.mxu0 %v1781_v0  ;;  %1458 = vmatprep.subr.bf16.mxu1 %v1781_v0 }
  0x48   :  { %1415 = vmatmul.mubr.bf16.vlgmr.msra.gmra.mxu0 %v55_v15 }
  0x49   :  { %1454 = vmatprep.mubr.msk.bf16.mxu0 %vm1782_vm0, %v1781_v0  ;;  %1439 = vmatpush3.bf16.msra.mxu0 %v1624_v18  ;;  %v1655_v18 = vld [vmem:[#allocation5 + $0x140] sm:$0xff]  }
  0x4a   :  { %1440 = vmatprep.subr.bf16.mxu0 %v1781_v0 }
  0x4d   :  { %1441 = vmatpush3.bf16.msra.mxu0 %v1625_v19  ;;  %v1656_v19 = vld [vmem:[#allocation5 + $0x1b8] sm:$0xff]  }
  0x4e   :  { %1442 = vmatprep.subr.bf16.mxu0 %v1781_v0 }
  0x51   :  { %1443 = vmatpush3.bf16.msra.mxu0 %v1626_v20  ;;  %v1657_v20 = vld [vmem:[#allocation5 + $0x1b0] sm:$0xff]  }
  0x52   :  { %1444 = vmatprep.subr.bf16.mxu0 %v1781_v0 }
  0x55   :  { %1445 = vmatpush3.bf16.msra.mxu0 %v1627_v21  ;;  %v1658_v21 = vld [vmem:[#allocation5 + $0x1a8] sm:$0xff]  }
  0x56   :  { %1446 = vmatprep.subr.bf16.mxu0 %v1781_v0 }
  0x59   :  { %1447 = vmatpush3.bf16.msra.mxu0 %v1628_v22  ;;  %v1659_v22 = vld [vmem:[#allocation5 + $0x1a0] sm:$0xff]  }
  0x5a   :  { %1448 = vmatprep.subr.bf16.mxu0 %v1781_v0 }
  0x5d   :  { %1449 = vmatpush3.bf16.msra.mxu0 %v1629_v23  ;;  %v1660_v23 = vld [vmem:[#allocation5 + $0x198] sm:$0xff]  }
  0x5e   :  { %1450 = vmatprep.subr.bf16.mxu0 %v1781_v0 }
  0x61   :  { %1451 = vmatpush3.bf16.msra.mxu0 %v1630_v32  ;;  %v1662_v32 = vld [vmem:[#allocation5 + $0x188] sm:$0xff]  }
  0x62   :  { %1452 = vmatprep.subr.bf16.mxu0 %v1781_v0 }
  0x65   :  { %1453 = vmatpush3.bf16.msra.mxu0 %v1631_v33  ;;  %v1663_v33 = vld [vmem:[#allocation5 + $0x180] sm:$0xff]  }
  0x66   :  { %1478 = vmatprep.subr.bf16.mxu0 %v1781_v0 }
 0x108   :  { %v161_v25 = vpop.f32.mrf.mxu0 }
 0x109   :  { %v162_v26 = vadd.f32 %v1218_v24, %v161_v25  ;;  %v1661_v24 = vld [vmem:[#allocation5 + $0x190] sm:$0xff]   ;;  %v1254_v25 = vld [vmem:[#allocation7 + $0x4] ss:$0 sm:$0xff] }
 0x10a   :  { %v1416_v27 = vpop.f32.mrf.mxu0 }
 0x10b   :  { %v167_v28 = vmax.f32 %v162_v26, 0.0 }
 0x10c   :  { %v164_v29 = vpop.f32.mrf.mxu0 }
 0x10d   :  { %v168_v30 = vpack.c.bf16 %v167_v28, %v167_v28 }
 0x10e   :  { %v1417_v31 = vpop.f32.mrf.mxu0 }
 0x10f   :  { %1435 = vmatmul.mubr.bf16.vlgmr.msra.gmra.mxu1 %v168_v30 }
 0x110   :  { %1474 = vmatprep.mubr.msk.bf16.mxu1 %vm1782_vm0, %v1781_v0  ;;  %1459 = vmatpush3.bf16.msra.mxu1 %v1632_v34  ;;  %v1664_v34 = vld [vmem:[#allocation5 + $0x1f8] sm:$0xff]  }
 0x111   :  { %1460 = vmatprep.subr.bf16.mxu1 %v1781_v0 }
 0x114   :  { %1461 = vmatpush3.bf16.msra.mxu1 %v1633_v35  ;;  %v1665_v35 = vld [vmem:[#allocation5 + $0x1f0] sm:$0xff]  }
 0x115   :  { %1462 = vmatprep.subr.bf16.mxu1 %v1781_v0 }
 0x118   :  { %1463 = vmatpush3.bf16.msra.mxu1 %v1634_v36  ;;  %v1666_v36 = vld [vmem:[#allocation5 + $0x1e8] sm:$0xff]  }
 0x119   :  { %1464 = vmatprep.subr.bf16.mxu1 %v1781_v0 }
 0x11c   :  { %1465 = vmatpush3.bf16.msra.mxu1 %v1635_v37  ;;  %v1667_v37 = vld [vmem:[#allocation5 + $0x1e0] sm:$0xff]  }
 0x11d   :  { %1466 = vmatprep.subr.bf16.mxu1 %v1781_v0 }
 0x120   :  { %1467 = vmatpush3.bf16.msra.mxu1 %v1636_v38  ;;  %v1668_v38 = vld [vmem:[#allocation5 + $0x1d8] sm:$0xff]  }
 0x121   :  { %1468 = vmatprep.subr.bf16.mxu1 %v1781_v0 }
 0x124   :  { %1469 = vmatpush3.bf16.msra.mxu1 %v1637_v39  ;;  %v1669_v39 = vld [vmem:[#allocation5 + $0x1d0] sm:$0xff]  }
 0x125   :  { %1470 = vmatprep.subr.bf16.mxu1 %v1781_v0 }
 0x128   :  { %1471 = vmatpush3.bf16.msra.mxu1 %v1638_v48  ;;  %v1670_v48 = vld [vmem:[#allocation5 + $0x1c8] sm:$0xff]  }
 0x129   :  { %1472 = vmatprep.subr.bf16.mxu1 %v1781_v0 }
 0x12c   :  { %1473 = vmatpush3.bf16.msra.mxu1 %v1639_v49  ;;  %v1671_v49 = vld [vmem:[#allocation5 + $0x1c0] sm:$0xff]  }
 0x12d   :  { %1498 = vmatprep.subr.bf16.mxu1 %v1781_v0 }
 0x1cf   :  { %v276_v41 = vpop.f32.mrf.mxu1 }
 0x1d0   :  { %v277_v42 = vadd.f32 %v1227_v40, %v276_v41  ;;  %v1263_v40 = vld [vmem:[#allocation7 + $0x5] ss:$0 sm:$0xff] }
 0x1d1   :  { %v1436_v43 = vpop.f32.mrf.mxu1 }
 0x1d2   :  { %v282_v44 = vmax.f32 %v277_v42, 0.0 }
 0x1d3   :  { %v279_v45 = vpop.f32.mrf.mxu1 }
 0x1d4   :  { %v283_v46 = vpack.c.bf16 %v282_v44, %v282_v44 }
 0x1d5   :  { %v1437_v47 = vpop.f32.mrf.mxu1 }
 0x1d6   :  { %1455 = vmatmul.mubr.bf16.vlgmr.msra.gmra.mxu0 %v283_v46 }
 0x1d7   :  { %1494 = vmatprep.mubr.msk.bf16.mxu0 %vm1782_vm0, %v1781_v0  ;;  %1479 = vmatpush3.bf16.msra.mxu0 %v1640_v50  ;;  %v1672_v50 = vld [vmem:[#allocation5 + $0x238] sm:$0xff]  }
 0x1d8   :  { %1480 = vmatprep.subr.bf16.mxu0 %v1781_v0 }
 0x1db   :  { %1481 = vmatpush3.bf16.msra.mxu0 %v1641_v51  ;;  %v1673_v51 = vld [vmem:[#allocation5 + $0x230] sm:$0xff]  }
 0x1dc   :  { %1482 = vmatprep.subr.bf16.mxu0 %v1781_v0 }
 0x1df   :  { %1483 = vmatpush3.bf16.msra.mxu0 %v1642_v52  ;;  %v1674_v52 = vld [vmem:[#allocation5 + $0x228] sm:$0xff]  }
 0x1e0   :  { %1484 = vmatprep.subr.bf16.mxu0 %v1781_v0 }
 0x1e3   :  { %1485 = vmatpush3.bf16.msra.mxu0 %v1643_v53  ;;  %v1675_v53 = vld [vmem:[#allocation5 + $0x220] sm:$0xff]  }
 0x1e4   :  { %1486 = vmatprep.subr.bf16.mxu0 %v1781_v0 }
 0x1e7   :  { %1487 = vmatpush3.bf16.msra.mxu0 %v1644_v54  ;;  %v1676_v54 = vld [vmem:[#allocation5 + $0x218] sm:$0xff]  }
 0x1e8   :  { %1488 = vmatprep.subr.bf16.mxu0 %v1781_v0 }
 0x1eb   :  { %1489 = vmatpush3.bf16.msra.mxu0 %v1645_v55  ;;  %v1677_v55 = vld [vmem:[#allocation5 + $0x210] sm:$0xff]  }
 0x1ec   :  { %1490 = vmatprep.subr.bf16.mxu0 %v1781_v0 }
 0x1ef   :  { %1491 = vmatpush3.bf16.msra.mxu0 %v1646_v1  ;;  %v1678_v1 = vld [vmem:[#allocation5 + $0x208] sm:$0xff]  }
 0x1f0   :  { %1492 = vmatprep.subr.bf16.mxu0 %v1781_v0 }
 0x1f3   :  { %1493 = vmatpush3.bf16.msra.mxu0 %v1647_v2  ;;  %v1679_v2 = vld [vmem:[#allocation5 + $0x200] sm:$0xff]  }
 0x1f4   :  { %1518 = vmatprep.subr.bf16.mxu0 %v1781_v0 }
 0x296   :  { %v391_v57 = vpop.f32.mrf.mxu0 }
 0x297   :  { %v392_v58 = vadd.f32 %v1236_v56, %v391_v57  ;;  %v1272_v56 = vld [vmem:[#allocation7 + $0x6] ss:$0 sm:$0xff] }
 0x298   :  { %v1456_v59 = vpop.f32.mrf.mxu0 }
 0x299   :  { %v397_v60 = vmax.f32 %v392_v58, 0.0 }
 0x29a   :  { %v394_v61 = vpop.f32.mrf.mxu0 }
 0x29b   :  { %v398_v62 = vpack.c.bf16 %v397_v60, %v397_v60 }
 0x29c   :  { %v1457_v63 = vpop.f32.mrf.mxu0 }
 0x29d   :  { %1475 = vmatmul.mubr.bf16.vlgmr.msra.gmra.mxu1 %v398_v62 }
 0x29e   :  { %1514 = vmatprep.mubr.msk.bf16.mxu1 %vm1782_vm0, %v1781_v0  ;;  %1499 = vmatpush3.bf16.msra.mxu1 %v1648_v3  ;;  %v1680_v3 = vld [vmem:[#allocation5 + $0x278] sm:$0xff]  }
 0x29f   :  { %1500 = vmatprep.subr.bf16.mxu1 %v1781_v0 }
 0x2a2   :  { %1501 = vmatpush3.bf16.msra.mxu1 %v1649_v4  ;;  %v1681_v4 = vld [vmem:[#allocation5 + $0x270] sm:$0xff]  }
 0x2a3   :  { %1502 = vmatprep.subr.bf16.mxu1 %v1781_v0 }
 0x2a6   :  { %1503 = vmatpush3.bf16.msra.mxu1 %v1650_v5  ;;  %v1682_v5 = vld [vmem:[#allocation5 + $0x268] sm:$0xff]  }
 0x2a7   :  { %1504 = vmatprep.subr.bf16.mxu1 %v1781_v0 }
 0x2aa   :  { %1505 = vmatpush3.bf16.msra.mxu1 %v1651_v6  ;;  %v1683_v6 = vld [vmem:[#allocation5 + $0x260] sm:$0xff]  }
 0x2ab   :  { %1506 = vmatprep.subr.bf16.mxu1 %v1781_v0 }
 0x2ae   :  { %1507 = vmatpush3.bf16.msra.mxu1 %v1652_v7  ;;  %v1684_v7 = vld [vmem:[#allocation5 + $0x258] sm:$0xff]  }
 0x2af   :  { %1508 = vmatprep.subr.bf16.mxu1 %v1781_v0 }
 0x2b2   :  { %1509 = vmatpush3.bf16.msra.mxu1 %v1653_v8  ;;  %v1685_v8 = vld [vmem:[#allocation5 + $0x250] sm:$0xff]  }
 0x2b3   :  { %1510 = vmatprep.subr.bf16.mxu1 %v1781_v0 }
 0x2b6   :  { %1511 = vmatpush3.bf16.msra.mxu1 %v1654_v9  ;;  %v1281_v9 = vld [vmem:[#allocation7 + $0x7] ss:$0 sm:$0xff] }
 0x2b7   :  { %1512 = vmatprep.subr.bf16.mxu1 %v1781_v0 }
 0x2ba   :  { %1513 = vmatpush3.bf16.msra.mxu1 %v1655_v18  ;;  %v1687_v18 = vld [vmem:[#allocation5 + $0x240] sm:$0xff]  }
 0x2bb   :  { %1538 = vmatprep.subr.bf16.mxu1 %v1781_v0 }
 0x35d   :  { %v506_v11 = vpop.f32.mrf.mxu1 }
 0x35e   :  { %v507_v12 = vadd.f32 %v1245_v10, %v506_v11 }
 0x35f   :  { %v1476_v13 = vpop.f32.mrf.mxu1 }
 0x360   :  { %v512_v14 = vmax.f32 %v507_v12, 0.0 }
 0x361   :  { %v509_v15 = vpop.f32.mrf.mxu1 }
 0x362   :  { %v513_v16 = vpack.c.bf16 %v512_v14, %v512_v14 }
 0x363   :  { %v1477_v17 = vpop.f32.mrf.mxu1 }
 0x364   :  { %1495 = vmatmul.mubr.bf16.vlgmr.msra.gmra.mxu0 %v513_v16  ;;  %v1686_v17 = vld [vmem:[#allocation5 + $0x248] sm:$0xff]  }
 0x365   :  { %1534 = vmatprep.mubr.msk.bf16.mxu0 %vm1782_vm0, %v1781_v0  ;;  %1519 = vmatpush3.bf16.msra.mxu0 %v1656_v19  ;;  %v1290_v19 = vld [vmem:[#allocation7 + $0x8] ss:$0 sm:$0xff] }
 0x366   :  { %1520 = vmatprep.subr.bf16.mxu0 %v1781_v0 }
 0x369   :  { %1521 = vmatpush3.bf16.msra.mxu0 %v1657_v20 }
 0x36a   :  { %1522 = vmatprep.subr.bf16.mxu0 %v1781_v0 }
 0x36d   :  { %1523 = vmatpush3.bf16.msra.mxu0 %v1658_v21 }
 0x36e   :  { %1524 = vmatprep.subr.bf16.mxu0 %v1781_v0 }
 0x371   :  { %1525 = vmatpush3.bf16.msra.mxu0 %v1659_v22 }
 0x372   :  { %1526 = vmatprep.subr.bf16.mxu0 %v1781_v0 }
 0x375   :  { %1527 = vmatpush3.bf16.msra.mxu0 %v1660_v23 }
 0x376   :  { %1528 = vmatprep.subr.bf16.mxu0 %v1781_v0 }
 0x379   :  { %1529 = vmatpush3.bf16.msra.mxu0 %v1661_v24 }
 0x37a   :  { %1530 = vmatprep.subr.bf16.mxu0 %v1781_v0 }
 0x37d   :  { %1531 = vmatpush3.bf16.msra.mxu0 %v1662_v32 }
 0x37e   :  { %1532 = vmatprep.subr.bf16.mxu0 %v1781_v0 }
 0x381   :  { %1533 = vmatpush3.bf16.msra.mxu0 %v1663_v33 }
 0x382   :  { %1558 = vmatprep.subr.bf16.mxu0 %v1781_v0 }
 0x424   :  { %v621_v26 = vpop.f32.mrf.mxu0 }
 0x425   :  { %v622_v27 = vadd.f32 %v1254_v25, %v621_v26 }
 0x426   :  { %v1496_v28 = vpop.f32.mrf.mxu0 }
 0x427   :  { %v627_v29 = vpack.c.bf16 %v622_v27, %v622_v27  ;;  %v1299_v27 = vld [vmem:[#allocation7 + $0x9] ss:$0 sm:$0xff] }
 0x428   :  { %v624_v30 = vpop.f32.mrf.mxu0 }
 0x429   :  { %1515 = vmatmul.mubr.bf16.vlgmr.msra.gmra.mxu1 %v627_v29 }
 0x42a   :  { %v1497_v31 = vpop.f32.mrf.mxu0  ;;  %1554 = vmatprep.mubr.msk.bf16.mxu1 %vm1782_vm0, %v1781_v0  ;;  %1539 = vmatpush3.bf16.msra.mxu1 %v1664_v34 }
 0x42b   :  { %1540 = vmatprep.subr.bf16.mxu1 %v1781_v0 }
 0x42e   :  { %1541 = vmatpush3.bf16.msra.mxu1 %v1665_v35 }
 0x42f   :  { %1542 = vmatprep.subr.bf16.mxu1 %v1781_v0 }
 0x432   :  { %1543 = vmatpush3.bf16.msra.mxu1 %v1666_v36 }
 0x433   :  { %1544 = vmatprep.subr.bf16.mxu1 %v1781_v0 }
 0x436   :  { %1545 = vmatpush3.bf16.msra.mxu1 %v1667_v37 }
 0x437   :  { %1546 = vmatprep.subr.bf16.mxu1 %v1781_v0 }
 0x43a   :  { %1547 = vmatpush3.bf16.msra.mxu1 %v1668_v38 }
 0x43b   :  { %1548 = vmatprep.subr.bf16.mxu1 %v1781_v0 }
 0x43e   :  { %1549 = vmatpush3.bf16.msra.mxu1 %v1669_v39 }
 0x43f   :  { %1550 = vmatprep.subr.bf16.mxu1 %v1781_v0 }
 0x442   :  { %1551 = vmatpush3.bf16.msra.mxu1 %v1670_v48 }
 0x443   :  { %1552 = vmatprep.subr.bf16.mxu1 %v1781_v0 }
 0x446   :  { %1553 = vmatpush3.bf16.msra.mxu1 %v1671_v49 }
 0x447   :  { %1578 = vmatprep.subr.bf16.mxu1 %v1781_v0 }
 0x4e9   :  { %v735_v41 = vpop.f32.mrf.mxu1 }
 0x4ea   :  { %v736_v42 = vadd.f32 %v1263_v40, %v735_v41 }
 0x4eb   :  { %v1516_v43 = vpop.f32.mrf.mxu1 }
 0x4ec   :  { %v741_v44 = vmax.f32 %v736_v42, 0.0 }
 0x4ed   :  { %v738_v45 = vpop.f32.mrf.mxu1 }
 0x4ee   :  { %v742_v46 = vpack.c.bf16 %v741_v44, %v741_v44 }
 0x4ef   :  { %v1517_v47 = vpop.f32.mrf.mxu1 }
 0x4f0   :  { %1535 = vmatmul.mubr.bf16.vlgmr.msra.gmra.mxu0 %v742_v46 }
 0x4f1   :  { %1574 = vmatprep.mubr.msk.bf16.mxu0 %vm1782_vm0, %v1781_v0  ;;  %1559 = vmatpush3.bf16.msra.mxu0 %v1672_v50 }
 0x4f2   :  { %1560 = vmatprep.subr.bf16.mxu0 %v1781_v0 }
 0x4f5   :  { %1561 = vmatpush3.bf16.msra.mxu0 %v1673_v51 }
 0x4f6   :  { %1562 = vmatprep.subr.bf16.mxu0 %v1781_v0 }
 0x4f9   :  { %1563 = vmatpush3.bf16.msra.mxu0 %v1674_v52 }
 0x4fa   :  { %1564 = vmatprep.subr.bf16.mxu0 %v1781_v0 }
 0x4fd   :  { %1565 = vmatpush3.bf16.msra.mxu0 %v1675_v53 }
 0x4fe   :  { %1566 = vmatprep.subr.bf16.mxu0 %v1781_v0 }
 0x501   :  { %1567 = vmatpush3.bf16.msra.mxu0 %v1676_v54 }
 0x502   :  { %1568 = vmatprep.subr.bf16.mxu0 %v1781_v0 }
 0x505   :  { %1569 = vmatpush3.bf16.msra.mxu0 %v1677_v55 }
 0x506   :  { %1570 = vmatprep.subr.bf16.mxu0 %v1781_v0 }
 0x509   :  { %1571 = vmatpush3.bf16.msra.mxu0 %v1678_v1 }
 0x50a   :  { %1572 = vmatprep.subr.bf16.mxu0 %v1781_v0 }
 0x50d   :  { %1573 = vmatpush3.bf16.msra.mxu0 %v1679_v2 }
 0x5b0   :  { %v850_v57 = vpop.f32.mrf.mxu0 }
 0x5b1   :  { %v851_v58 = vadd.f32 %v1272_v56, %v850_v57 }
 0x5b2   :  { %v1536_v59 = vpop.f32.mrf.mxu0 }
 0x5b3   :  { %v856_v60 = vmax.f32 %v851_v58, 0.0 }
 0x5b4   :  { %v853_v61 = vpop.f32.mrf.mxu0 }
 0x5b5   :  { %v857_v62 = vpack.c.bf16 %v856_v60, %v856_v60 }
 0x5b6   :  { %v1537_v63 = vpop.f32.mrf.mxu0 }
 0x5b7   :  { %1555 = vmatmul.mubr.bf16.vlgmr.msra.gmra.mxu1 %v857_v62 }
 0x5b8   :  { %1594 = vmatprep.mubr.msk.bf16.mxu1 %vm1782_vm0, %v1781_v0  ;;  %1579 = vmatpush3.bf16.msra.mxu1 %v1680_v3 }
 0x5b9   :  { %1580 = vmatprep.subr.bf16.mxu1 %v1781_v0 }
 0x5bc   :  { %1581 = vmatpush3.bf16.msra.mxu1 %v1681_v4 }
 0x5bd   :  { %1582 = vmatprep.subr.bf16.mxu1 %v1781_v0 }
 0x5c0   :  { %1583 = vmatpush3.bf16.msra.mxu1 %v1682_v5 }
 0x5c1   :  { %1584 = vmatprep.subr.bf16.mxu1 %v1781_v0 }
 0x5c4   :  { %1585 = vmatpush3.bf16.msra.mxu1 %v1683_v6 }
 0x5c5   :  { %1586 = vmatprep.subr.bf16.mxu1 %v1781_v0 }
 0x5c8   :  { %1587 = vmatpush3.bf16.msra.mxu1 %v1684_v7 }
 0x5c9   :  { %1588 = vmatprep.subr.bf16.mxu1 %v1781_v0 }
 0x5cc   :  { %1589 = vmatpush3.bf16.msra.mxu1 %v1685_v8 }
 0x5cd   :  { %1590 = vmatprep.subr.bf16.mxu1 %v1781_v0 }
 0x5d0   :  { %1591 = vmatpush3.bf16.msra.mxu1 %v1686_v17 }
 0x5d1   :  { %1592 = vmatprep.subr.bf16.mxu1 %v1781_v0 }
 0x5d4   :  { %1593 = vmatpush3.bf16.msra.mxu1 %v1687_v18 }
 0x677   :  { %v965_v10 = vpop.f32.mrf.mxu1 }
 0x678   :  { %v966_v11 = vadd.f32 %v1281_v9, %v965_v10 }
 0x679   :  { %v1556_v12 = vpop.f32.mrf.mxu1 }
 0x67a   :  { %v971_v13 = vmax.f32 %v966_v11, 0.0 }
 0x67b   :  { %v968_v14 = vpop.f32.mrf.mxu1 }
 0x67c   :  { %v972_v15 = vpack.c.bf16 %v971_v13, %v971_v13 }
 0x67d   :  { %v1557_v16 = vpop.f32.mrf.mxu1 }
 0x67e   :  { %1575 = vmatmul.mubr.bf16.vlgmr.msra.gmra.mxu0 %v972_v15 }
 0x73e   :  { %v1080_v20 = vpop.f32.mrf.mxu0 }
 0x73f   :  { %v1081_v21 = vadd.f32 %v1290_v19, %v1080_v20 }
 0x740   :  { %v1576_v22 = vpop.f32.mrf.mxu0 }
 0x741   :  { %v1086_v23 = vmax.f32 %v1081_v21, 0.0 }
 0x742   :  { %v1083_v24 = vpop.f32.mrf.mxu0 }
 0x743   :  { %v1087_v25 = vpack.c.bf16 %v1086_v23, %v1086_v23 }
 0x744   :  { %v1577_v26 = vpop.f32.mrf.mxu0 }
 0x745   :  { %1595 = vmatmul.mubr.bf16.vlgmr.msra.gmra.mxu1 %v1087_v25 }
 0x805   :  { %v1195_v28 = vpop.f32.mrf.mxu1 }
 0x806   :  { %v1196_v29 = vadd.f32 %v1299_v27, %v1195_v28 }
 0x807   :  { %v1596_v30 = vpop.f32.mrf.mxu1 }
 0x808   :  { %1201 = vst [vmem:[#allocation8] sm:$0xff] %v1196_v29 }
 0x809   :  { %v1198_v0 = vpop.f32.mrf.mxu1 }
 0x80a   :  { %1759 = shalt.err (!%p1756_p5)
}
 0x80b   :  { %1211 = dma.vmem_to_hbm [thread:$0]  %s1209_s2, 128, %s1919_s3, [#allocation4]   ;;  %v1597_v31 = vpop.f32.mrf.mxu1 }
 0x80c   :  { %1772 = dma.done.wait [#allocation4], 128  }
 0x80d   :  { %1773 = vsyncadd [#allocation4], 4294967168 }
 0x80e   :  { %1215 = vsyncpa [#allocation3], 1 }
 0x80f   :  { %1216 = vsyncpa [#allocation6], 1 }
 0x810   :  { %1217 = vsyncpa [#allocation4], 1 }

</bundles_post_ra>
